<compile_context>
chip_gen: v5e
topology: v5e:2x2
jax: 0.10.0
libtpu: 0.0.40
codegen_flags: <defaults>
</compile_context>

<pallas_src>
import functools

import jax
import jax.numpy as jnp
from jax import lax
from jax.experimental import pallas as pl
from jax.experimental.pallas import tpu as pltpu


NEG_SLOPE = 0.01            # PyTorch nn.LeakyReLU default negative_slope
MAX_SPATIAL_TILE = 32768    # lanes per grid step (f32), review-recommended 8K-32K


def _round_up(x, m):
    return ((x + m - 1) // m) * m


def _choose_spatial_tile(HW, N, max_tile):
    """Pick (ts, HW_pad) for the spatial (lane) axis.

    * Prefer a tile that divides HW exactly (no wrapper pad / output slice,
      i.e. no extra HBM passes) -- always possible when HW % 128 == 0.
    * ts is a multiple of 128 (lane width) and <= max_tile.
    * v7x: keep total grid steps (N * num_tiles) >= 2 so both TensorCores
      get work under dimension_semantics=("parallel", "parallel").
    """
    if HW % 128 == 0:
        q = HW // 128
        best = 1
        d = 1
        while d * d <= q:
            if q % d == 0:
                for cand in (d, q // d):
                    if cand * 128 <= max_tile and cand > best:
                        best = cand
            d += 1
        ts = 128 * best
        HW_pad = HW
    else:
        # Ragged spatial size: fall back to padding the lane axis.
        # TODO(synk): handle the ragged last tile in-kernel (masked store with
        # a scalar-prefetched HW) instead of a wrapper-side pad + slice.
        ts = min(max_tile, _round_up(HW, 128))
        HW_pad = _round_up(HW, ts)

    if N * (HW_pad // ts) < 2 and ts % 256 == 0:
        ts //= 2  # split the single tile so a 2-TC chip (v7x) isn't half idle
    return ts, HW_pad


def _choose_lane_chunk(ts, max_channels):
    """Largest chunk in {1024,512,256,128} dividing ts whose widest live
    activation (max_channels x chunk f32) stays <= ~96 KiB (~24 vregs)."""
    for c in (1024, 512, 256, 128):
        if ts % c == 0 and c * max_channels * 4 <= 96 * 1024:
            return c
    return next(c for c in (1024, 512, 256, 128) if ts % c == 0)


def _make_fused_mlp_kernel(num_layers, ts, chunk):
    """Kernel: refs = (x_ref, w0, b0, w1, b1, ..., o_ref).

    x_ref block:  (1, Cin0, ts)      -- one batch element, spatial tile on lanes
    w_i  block:   (Cout_i, Cin_i)    -- full weight, resident in VMEM
    b_i  block:   (Cout_i, 1)
    o_ref block:  (1, Cout_last, ts)
    """
    n_chunks = ts // chunk

    def kernel(*refs):
        x_ref = refs[0]
        o_ref = refs[-1]
        wb = refs[1:-1]

        def compute_chunk(start):
            x = x_ref[0, :, pl.ds(start, chunk)]          # (Cin0, chunk) f32
            for i in range(num_layers):
                w = wb[2 * i][...]                          # (Cout_i, Cin_i)
                b = wb[2 * i + 1][...]                      # (Cout_i, 1)
                y = jnp.dot(w, x, preferred_element_type=jnp.float32) + b
                x = jnp.maximum(y, NEG_SLOPE * y)           # LeakyReLU(0.01)
            o_ref[0, :, pl.ds(start, chunk)] = x.astype(o_ref.dtype)

        if n_chunks == 1:
            compute_chunk(0)
        else:
            def body(c, carry):
                compute_chunk(pl.multiple_of(c * chunk, 128))
                return carry
            lax.fori_loop(0, n_chunks, body, 0)

    return kernel


@functools.partial(jax.jit, static_argnames=("max_spatial_tile",))
def mlp_forward(x_nchw, params, *, max_spatial_tile=MAX_SPATIAL_TILE):
    """Forward pass of MLP on an NCHW input, returning NCHW output.

    params: list of (W, b) with W: (Cout, Cin) (PyTorch conv weight squeezed),
            b: (Cout,).
    """
    N, C, H, W = x_nchw.shape
    HW = H * W
    x = x_nchw.reshape(N, C, HW)  # pure view: NCHW is contiguous in (N, C, HW)

    ts, HW_pad = _choose_spatial_tile(HW, N, max_spatial_tile)
    if HW_pad != HW:
        x = jnp.pad(x, ((0, 0), (0, 0), (0, HW_pad - HW)))

    num_layers = len(params)
    c_out = params[-1][0].shape[0]
    max_ch = max([C] + [w.shape[0] for (w, _) in params])
    chunk = _choose_lane_chunk(ts, max_ch)

    in_specs = [pl.BlockSpec((1, C, ts), lambda n, s: (n, 0, s))]
    args = [x]
    wb_bytes = 0
    for (w, b) in params:
        co, ci = w.shape
        in_specs.append(pl.BlockSpec((co, ci), lambda n, s: (0, 0)))
        in_specs.append(pl.BlockSpec((co, 1), lambda n, s: (0, 0)))
        args.append(w)
        args.append(b.reshape(co, 1))
        wb_bytes += (co * ci + co) * 4

    # VMEM budget: double-buffered input + output tiles plus resident weights,
    # with 2x headroom, clamped to [16 MiB, 48 MiB] (v7x physical VMEM = 64 MiB).
    tile_bytes = 2 * (C + c_out) * ts * 4 + 2 * wb_bytes
    vmem_limit = int(min(48 * 1024 * 1024, max(16 * 1024 * 1024, 2 * tile_bytes)))

    out = pl.pallas_call(
        _make_fused_mlp_kernel(num_layers, ts, chunk),
        out_shape=jax.ShapeDtypeStruct((N, c_out, HW_pad), x_nchw.dtype),
        grid_spec=pltpu.PrefetchScalarGridSpec(
            num_scalar_prefetch=0,
            grid=(N, HW_pad // ts),
            in_specs=in_specs,
            out_specs=pl.BlockSpec((1, c_out, ts), lambda n, s: (n, 0, s)),
        ),
        compiler_params=pltpu.CompilerParams(
            dimension_semantics=("parallel", "parallel"),
            vmem_limit_bytes=vmem_limit,
        ),
    )(*args)

    if HW_pad != HW:
        out = out[:, :, :HW]
    return out.reshape(N, c_out, H, W)


def init_mlp_params(key, mlp_list):
    """Deterministic params for each nn.Conv2d(mlp_list[i], mlp_list[i+1], 1).

    Conv2d weight (Cout, Cin, 1, 1) is stored squeezed as (Cout, Cin), plus a
    (Cout,) bias -- matching PyTorch's layout directly.
    """
    params = []
    for i in range(len(mlp_list) - 1):
        cin, cout = mlp_list[i], mlp_list[i + 1]
        key, kw, kb = jax.random.split(key, 3)
        bound = 1.0 / jnp.sqrt(cin)  # PyTorch kaiming-uniform-ish fan_in bound
        w = jax.random.uniform(kw, (cout, cin), jnp.float32, -bound, bound)
        b = jax.random.uniform(kb, (cout,), jnp.float32, -bound, bound)
        params.append((w, b))
    return params


def mlp_forward_ref(x_nchw, params):
    """Pure-JAX reference (same math, no Pallas) for correctness checking."""
    x = x_nchw
    for (w, b) in params:
        y = jnp.einsum("oc,nchw->nohw", w, x) + b[None, :, None, None]
        x = jnp.where(y >= 0, y, NEG_SLOPE * y)
    return x


if __name__ == "__main__":
    key = jax.random.PRNGKey(0)
    kx, kp = jax.random.split(key)

    # Small shapes: batch=2, spatial=16x16, channel schedule [4, 32, 8].
    mlp_list = [4, 32, 8]
    x = jax.random.normal(kx, (2, mlp_list[0], 16, 16), dtype=jnp.float32)
    params = init_mlp_params(kp, mlp_list)

    out = mlp_forward(x, params)
    out = jax.block_until_ready(out)

    ref = mlp_forward_ref(x, params)
    assert out.shape == (2, mlp_list[-1], 16, 16), out.shape
    assert jnp.allclose(out, ref, atol=1e-5, rtol=1e-5), "mismatch vs reference"

    print("KERNEL_OK")
</pallas_src>

<mosaic_0001>
module attributes {stable_mosaic.version = 11 : i64} {
  func.func @kernel(%arg0: i32, %arg1: i32, %arg2: memref<1x4x256xf32, #tpu.memory_space<vmem>>, %arg3: memref<32x4xf32, #tpu.memory_space<vmem>>, %arg4: memref<32x1xf32, #tpu.memory_space<vmem>>, %arg5: memref<8x32xf32, #tpu.memory_space<vmem>>, %arg6: memref<8x1xf32, #tpu.memory_space<vmem>>, %arg7: memref<1x8x256xf32, #tpu.memory_space<vmem>>) attributes {dimension_semantics = [#tpu.dimension_semantics<parallel>, #tpu.dimension_semantics<parallel>], iteration_bounds = array<i64: 2, 1>, scalar_prefetch = 0 : i64, scratch_operands = 0 : i64, tpu.core_type = #tpu.core_type<tc>, window_params = [{transform_indices = @transform_0, window_bounds = array<i64: 1, 4, 256>}, {pipeline_mode = #tpu.pipeline_mode<synchronous>, transform_indices = @transform_1, window_bounds = array<i64: 32, 4>}, {pipeline_mode = #tpu.pipeline_mode<synchronous>, transform_indices = @transform_2, window_bounds = array<i64: 32, 1>}, {pipeline_mode = #tpu.pipeline_mode<synchronous>, transform_indices = @transform_3, window_bounds = array<i64: 8, 32>}, {pipeline_mode = #tpu.pipeline_mode<synchronous>, transform_indices = @transform_4, window_bounds = array<i64: 8, 1>}, {transform_indices = @transform_5, window_bounds = array<i64: 1, 8, 256>}]} {
    %c0 = arith.constant 0 : index
    %c0_0 = arith.constant 0 : index
    %c0_1 = arith.constant 0 : index
    %0 = vector.load %arg2[%c0, %c0_0, %c0_1] : memref<1x4x256xf32, #tpu.memory_space<vmem>>, vector<1x4x256xf32>
    %1 = vector.shape_cast %0 : vector<1x4x256xf32> to vector<4x256xf32>
    %c0_2 = arith.constant 0 : index
    %c0_3 = arith.constant 0 : index
    %2 = vector.load %arg3[%c0_2, %c0_3] : memref<32x4xf32, #tpu.memory_space<vmem>>, vector<32x4xf32>
    %c0_4 = arith.constant 0 : index
    %c0_5 = arith.constant 0 : index
    %3 = vector.load %arg4[%c0_4, %c0_5] : memref<32x1xf32, #tpu.memory_space<vmem>>, vector<32x1xf32>
    %cst = arith.constant dense<0.000000e+00> : vector<32x256xf32>
    %4 = tpu.matmul %2, %1, %cst {dimension_numbers = #tpu.dot_dimension_numbers<[1], [0], [0], [1], [0, 0, 1, 1], [], []>} : vector<32x4xf32>, vector<4x256xf32>, vector<32x256xf32> -> vector<32x256xf32>
    %5 = vector.broadcast %3 : vector<32x1xf32> to vector<32x256xf32>
    %6 = arith.addf %4, %5 : vector<32x256xf32>
    %cst_6 = arith.constant 0.00999999977 : f32
    %7 = vector.broadcast %cst_6 : f32 to vector<32x256xf32>
    %8 = arith.mulf %7, %6 : vector<32x256xf32>
    %9 = arith.maximumf %6, %8 : vector<32x256xf32>
    %c0_7 = arith.constant 0 : index
    %c0_8 = arith.constant 0 : index
    %10 = vector.load %arg5[%c0_7, %c0_8] : memref<8x32xf32, #tpu.memory_space<vmem>>, vector<8x32xf32>
    %c0_9 = arith.constant 0 : index
    %c0_10 = arith.constant 0 : index
    %11 = vector.load %arg6[%c0_9, %c0_10] : memref<8x1xf32, #tpu.memory_space<vmem>>, vector<8x1xf32>
    %cst_11 = arith.constant dense<0.000000e+00> : vector<8x256xf32>
    %12 = tpu.matmul %10, %9, %cst_11 {dimension_numbers = #tpu.dot_dimension_numbers<[1], [0], [0], [1], [0, 0, 1, 1], [], []>} : vector<8x32xf32>, vector<32x256xf32>, vector<8x256xf32> -> vector<8x256xf32>
    %13 = vector.broadcast %11 : vector<8x1xf32> to vector<8x256xf32>
    %14 = arith.addf %12, %13 : vector<8x256xf32>
    %cst_12 = arith.constant 0.00999999977 : f32
    %15 = vector.broadcast %cst_12 : f32 to vector<8x256xf32>
    %16 = arith.mulf %15, %14 : vector<8x256xf32>
    %17 = arith.maximumf %14, %16 : vector<8x256xf32>
    %c0_13 = arith.constant 0 : index
    %c0_14 = arith.constant 0 : index
    %c0_15 = arith.constant 0 : index
    %18 = vector.load %arg7[%c0_13, %c0_14, %c0_15] : memref<1x8x256xf32, #tpu.memory_space<vmem>>, vector<1x8x256xf32>
    %19 = vector.shape_cast %18 : vector<1x8x256xf32> to vector<8x256xf32>
    %20 = vector.shape_cast %17 : vector<8x256xf32> to vector<1x8x256xf32>
    tpu.vector_store %arg7[%c0_13, %c0_14, %c0_15], %20 {strides = array<i32>} : memref<1x8x256xf32, #tpu.memory_space<vmem>>, vector<1x8x256xf32>,
    return
  }
  func.func @transform_0(%arg0: i32, %arg1: i32) -> (i32, i32, i32) {
    %c0_i32 = arith.constant 0 : i32
    %c0_i32_0 = arith.constant 0 : i32
    return %arg0, %c0_i32, %arg1 : i32, i32, i32
  }
  func.func @transform_1(%arg0: i32, %arg1: i32) -> (i32, i32) {
    %c0_i32 = arith.constant 0 : i32
    %c0_i32_0 = arith.constant 0 : i32
    %c0_i32_1 = arith.constant 0 : i32
    return %c0_i32, %c0_i32_0 : i32, i32
  }
  func.func @transform_2(%arg0: i32, %arg1: i32) -> (i32, i32) {
    %c0_i32 = arith.constant 0 : i32
    %c0_i32_0 = arith.constant 0 : i32
    %c0_i32_1 = arith.constant 0 : i32
    return %c0_i32, %c0_i32_0 : i32, i32
  }
  func.func @transform_3(%arg0: i32, %arg1: i32) -> (i32, i32) {
    %c0_i32 = arith.constant 0 : i32
    %c0_i32_0 = arith.constant 0 : i32
    %c0_i32_1 = arith.constant 0 : i32
    return %c0_i32, %c0_i32_0 : i32, i32
  }
  func.func @transform_4(%arg0: i32, %arg1: i32) -> (i32, i32) {
    %c0_i32 = arith.constant 0 : i32
    %c0_i32_0 = arith.constant 0 : i32
    %c0_i32_1 = arith.constant 0 : i32
    return %c0_i32, %c0_i32_0 : i32, i32
  }
  func.func @transform_5(%arg0: i32, %arg1: i32) -> (i32, i32, i32) {
    %c0_i32 = arith.constant 0 : i32
    %c0_i32_0 = arith.constant 0 : i32
    return %arg0, %c0_i32, %arg1 : i32, i32, i32
  }
}

</mosaic_0001>

<bundles_post_ra>
// kernel: mlp_forward.1
= control target key start
LH: loop header
LB: loop body
LE: loop exit
PB: predicated region body
PF: predicated region fallthrough
CT: control target
= control target key end

     0   :  { %s643_s18 = smov 0   ;;  %s645_s19 = smov 0   ;;  %s718_s0 = inlined_call_operand.vmem [shape: f32[2,4,256], index: 0, kind: input, shape index: {}]   ;;  %s719_s1 = inlined_call_operand.vmem [shape: f32[32,4], index: 1, kind: input, shape index: {}]   ;;  %s720_s2 = inlined_call_operand.vmem [shape: f32[32,1], index: 2, kind: input, shape index: {}]   ;;  %s721_s3 = inlined_call_operand.vmem [shape: f32[8,32], index: 3, kind: input, shape index: {}]   ;;  %s722_s4 = inlined_call_operand.vmem [shape: f32[8,1], index: 4, kind: input, shape index: {}]   ;;  %s723_s5 = inlined_call_operand.vmem [shape: f32[2,8,256], index: 5, kind: output, shape index: {}]  }
   0x1   :  { %s647_s20 = smov 0  }
   0x2 LB: > { %s27_s21 = sadd.s32 1, %s606_s19  ;;  %p537_p0 = scmp.ge.s32.totalorder %s610_s20, 1  ;;  %s610_s20 = sphi %s647_s20, %s15_s20   ;;  %s606_s19 = sphi %s645_s19, %s725_s19   ;;  %s602_s18 = sphi %s643_s18, %s724_s18  }
   0x3   : > { %p29_p1 = scmp.ge.s32.totalorder %s27_s21, 2  ;;  %p208_p2 = scmp.lt.s32.totalorder %s610_s20, 3 }
   0x5   : > { %s727_s21 = smov (%p29_p1, %s27_s21), 0  ;;  %p209_p3 = pnand %p537_p0, %p208_p2 }
   0x6   : > { %p245_p4 = scmp.lt.s32.totalorder (!%p209_p3), %s602_s18, 1 }
   0x7   : > { %212 = sbr.rel (%p209_p3) target bundleno = 319 (0x13f), region = 40 }
   0xc   : > { %v612_v0 = vmov 0   ;;  %v270_v1 = vld [vmem:[%s720_s2 + $0x8] sm:$0xff]  ;;  %v272_v2 = vld [vmem:[%s720_s2 + $0x18] sm:$0xff]  ;;  %s729_s18 = smov (!%p245_p4, %s602_s18), 1  ;;  %v269_v4 = vld [vmem:[%s720_s2] sm:$0xff]  ;;  %vm310_vm0 = vcmask 1043456  }
   0xd   : > { %586 = vset.pattern.permute.xlu1 %v612_v0  ;;  %585 = vset.pattern.permute.xlu0 %v612_v0  ;;  %s556_s26 = sshll.u32 %s729_s18, 3  ;;  %v271_v5 = vld [vmem:[%s720_s2 + $0x10] sm:$0xff]  ;;  %v265_v6 = vld [vmem:[%s719_s1] sm:$0xff]  ;;  %vm297_vm1 = vcmask 31744   ;;  %v268_v7 = vld [vmem:[%s719_s1 + $0x18] sm:$0xff]  ;;  %vm396_vm2 = vcmask 261120  }
   0xe   : > { %280 = vperm.xlu1 %586, %v270_v1   ;;  %290 = vperm.xlu0 %585, %v272_v2   ;;  %s252_s29 = scalar_lea.vmem %s718_s0, %s556_s26  ;;  %v266_v10 = vld [vmem:[%s719_s1 + $0x8] sm:$0xff]  ;;  %v267_v11 = vld [vmem:[%s719_s1 + $0x10] sm:$0xff]  ;;  %v390_v12 = vld [vmem:[%s722_s4] sm:$0xff]  ;;  %s557_s25 = sshll.u32 %s729_s18, 4 }
   0xf   : > { %587 = vset.pattern.permute.xlu2 %v612_v0  ;;  %v264_v3 = vld [vmem:[%s252_s29] sm:$0xff]  ;;  %s262_s28 = scalar_lea.vmem %s723_s5, %s557_s25 }
  0x10   : > { %294 = vst [vmem:[#allocation1] ss:$2 sm:$0xff] %v264_v3  ;;  %393 = vperm.xlu2 %587, %v390_v12   ;;  %v389_v48 = vld [vmem:[%s721_s3] sm:$0xff] }
  0x16   : > { %275 = vperm.xlu1 %586, %v269_v4   ;;  %285 = vperm.xlu0 %585, %v271_v5  }
  0x17   : > { %v295_v8 = vld.sshfl [vmem:[#allocation1] sm:$0xff pattern:$0x75316420]  ;;  %v296_v9 = vld.sshfl [vmem:[#allocation1 + $0x8] sm:$0xff pattern:$0x75316420] }
  0x18   : > { %542 = vmatpush.msk.msra.mxu0 %vm310_vm0, %v295_v8  ;;  %558 = vmatpush.msk.msra.mxu2 %vm310_vm0, %v295_v8 }
  0x19   : > { %547 = vmatpush.msk.msra.mxu1 %vm310_vm0, %v296_v9  ;;  %559 = vmatpush.msk.msra.mxu3 %vm310_vm0, %v296_v9 }
  0x1a   : > { %543 = vmatmul.msk.f32.vlgmr.msra.gmra.mxu0 %vm297_vm1, %v265_v6  ;;  %546 = vmatmul.msk.f32.vlgmr.msra.gmra.mxu2 %vm297_vm1, %v268_v7 }
  0x1b   : > { %548 = vmatmul.msk.f32.vlgmr.msra.gmra.mxu1 %vm297_vm1, %v265_v6  ;;  %551 = vmatmul.msk.f32.vlgmr.msra.gmra.mxu3 %vm297_vm1, %v268_v7 }
  0x22   : > { %544 = vmatmul.msk.f32.gmra.mxu0 %vm297_vm1, %v266_v10 }
  0x23   : > { %549 = vmatmul.msk.f32.gmra.mxu1 %vm297_vm1, %v266_v10 }
  0x2a   : > { %545 = vmatmul.msk.f32.gmra.mxu0 %vm297_vm1, %v267_v11 }
  0x2b   : > { %550 = vmatmul.msk.f32.gmra.mxu1 %vm297_vm1, %v267_v11 }
  0x6a   : > { %v394_v50 = vpop.permute.xlu2 %393 }
  0x80   : > { %v281_v15 = vpop.permute.xlu1 %280  ;;  %v291_v16 = vpop.permute.xlu0 %290 }
  0x88   : > { %v276_v27 = vpop.permute.xlu1 %275  ;;  %v286_v29 = vpop.permute.xlu0 %285 }
  0x97   : > { %v332_v13 = vpop.f32.mrf.mxu0 }
  0x98   : > { %v361_v14 = vpop.f32.mrf.mxu1  ;;  %v333_v32 = vadd.f32 %v332_v13, %v276_v27 }
  0x99   : > { %v362_v35 = vadd.f32 %v361_v14, %v276_v27 }
  0x9a   : > { %v373_v41 = vmul.f32 0.01, %v333_v32 }
  0x9b   : > { %v374_v43 = vmul.f32 0.01, %v362_v35 }
  0x9c   : > { %v381_v47 = vmax.f32 %v333_v32, %v373_v41 }
  0x9d   : > { %v341_v17 = vpop.f32.mrf.mxu2  ;;  %v382_v49 = vmax.f32 %v362_v35, %v374_v43 }
  0x9e   : > { %v342_v18 = vadd.f32 %v341_v17, %v291_v16  ;;  %v370_v19 = vpop.f32.mrf.mxu3 }
  0x9f   : > { %v371_v20 = vadd.f32 %v370_v19, %v291_v16  ;;  %v335_v21 = vpop.f32.mrf.mxu0 }
  0xa0   : > { %v379_v22 = vmul.f32 0.01, %v342_v18  ;;  %v364_v23 = vpop.f32.mrf.mxu1  ;;  %v336_v28 = vadd.f32 %v335_v21, %v281_v15 }
  0xa1   : > { %v380_v24 = vmul.f32 0.01, %v371_v20  ;;  %v365_v30 = vadd.f32 %v364_v23, %v281_v15 }
  0xa2   : > { %v387_v25 = vmax.f32 %v342_v18, %v379_v22  ;;  %v375_v37 = vmul.f32 0.01, %v336_v28 }
  0xa3   : > { %v388_v26 = vmax.f32 %v371_v20, %v380_v24  ;;  %v376_v39 = vmul.f32 0.01, %v365_v30 }
  0xa4   : > { %412 = vmatpush.msrb.mxu2 %v387_v25  ;;  %v383_v45 = vmax.f32 %v336_v28, %v375_v37 }
  0xa5   : > { %432 = vmatpush.msrb.mxu3 %v388_v26  ;;  %v384_v46 = vmax.f32 %v365_v30, %v376_v39 }
  0xa7   : > { %v338_v31 = vpop.f32.mrf.mxu0 }
  0xa8   : > { %v339_v33 = vadd.f32 %v338_v31, %v286_v29  ;;  %v367_v34 = vpop.f32.mrf.mxu1 }
  0xa9   : > { %v368_v36 = vadd.f32 %v367_v34, %v286_v29 }
  0xaa   : > { %v377_v38 = vmul.f32 0.01, %v339_v33 }
  0xab   : > { %v378_v40 = vmul.f32 0.01, %v368_v36 }
  0xac   : > { %v385_v42 = vmax.f32 %v339_v33, %v377_v38 }
  0xad   : > { %v386_v44 = vmax.f32 %v368_v36, %v378_v40 }
  0xae   : > { %413 = vmatpush.msrb.mxu2 %v385_v42 }
  0xaf   : > { %433 = vmatpush.msrb.mxu3 %v386_v44 }
  0xb0   : > { %414 = vmatpush.msrb.mxu2 %v383_v45 }
  0xb1   : > { %434 = vmatpush.msrb.mxu3 %v384_v46 }
  0xb2   : > { %415 = vmatpush.msrb.mxu2 %v381_v47 }
  0xb3   : > { %435 = vmatpush.msrb.mxu3 %v382_v49  ;;  %552 = vmatmul.msk.f32.vlgmr.msrb.gmra.mxu2 %vm396_vm2, %v389_v48 }
  0xb4   : > { %553 = vmatmul.msk.f32.vlgmr.msrb.gmra.mxu3 %vm396_vm2, %v389_v48 }
 0x136   : > { %v417_v51 = vpop.f32.mrf.mxu2 }
 0x137   : > { %v418_v52 = vadd.f32 %v417_v51, %v394_v50  ;;  %v437_v53 = vpop.f32.mrf.mxu3 }
 0x138   : > { %v438_v54 = vadd.f32 %v437_v53, %v394_v50 }
 0x139   : > { %v440_v55 = vmul.f32 0.01, %v418_v52 }
 0x13a   : > { %v441_v56 = vmul.f32 0.01, %v438_v54 }
 0x13b   : > { %v442_v57 = vmax.f32 %v418_v52, %v440_v55 }
 0x13c   : > { %v443_v58 = vmax.f32 %v438_v54, %v441_v56 }
 0x13d   : > { %444 = vst [vmem:[%s262_s28] sm:$0xff] %v442_v57 }
 0x13e   : > { %445 = vst [vmem:[%s262_s28 + $0x8] sm:$0xff] %v443_v58 }
 0x13f PF: > { %s15_s20 = sadd.s32 1, %s610_s20   ;;  %s724_s18 = smov %s606_s19 }
 0x140   : > { %p12_p5 = scmp.ge.s32.totalorder %s15_s20, 4   ;;  %s725_s19 = smov %s727_s21 }
 0x142   :  { %14 = sbr.rel (!%p12_p5) target bundleno = 2 (0x2), region = 70 }

</bundles_post_ra>
